<compile_context>
chip_gen: v5e
topology: v5e:2x2
jax: 0.10.0
libtpu: 0.0.40
codegen_flags: <defaults>
</compile_context>

<pallas_src>
import functools

import jax
import jax.numpy as jnp
from jax.experimental import pallas as pl
from jax.experimental.pallas import tpu as pltpu


def _fused_affine_kernel(coef_ref, x_ref, o_ref):
    # coef_ref : SMEM [3] f32  -- (a, b, c) of the fused affine map
    # x_ref    : VMEM [2, TILE_R, 128]   (dense (rows, 128) point tiles)
    # o_ref    : VMEM [TILE_R, 128]
    a = coef_ref[0]
    b = coef_ref[1]
    c = coef_ref[2]
    # Two VPU broadcast FMAs on fully dense tiles; purely HBM-bound.
    o_ref[...] = a * x_ref[0] + b * x_ref[1] + c


def _round_up(v, m):
    return ((v + m - 1) // m) * m


# Below this many 128-point rows it is not worth splitting into 2 grid steps
# just for megacore; per-step overhead would dominate.
_MIN_SPLIT_ROWS = 1024


@functools.partial(jax.jit, static_argnames=("tile_r_max",))
def circle_model_naiwna_forward(x, w1, b1, w2, b2, tile_r_max=4096):
    """Forward pass of CircleModel_Naiwna.

    Args:
      x : [N, 2] float32
      w1: [8, 2] float32 (PyTorch layout [out, in])
      b1: [8]    float32
      w2: [1, 8] float32 (PyTorch layout [out, in])
      b2: [1]    float32
      tile_r_max: max rows (of 128 points each) per grid step.
    Returns:
      [N, 1] float32
    """
    n = x.shape[0]

    # ---- Algebraic fusion of the two activation-free linears ----
    # y = x @ W1.T @ W2.T + (b1 @ W2.T + b2) = a*x[:,0] + b*x[:,1] + c
    # Computed with elementwise f32 sums (no reduced-precision matmul pass).
    w_eff = jnp.sum(w2[0][:, None].astype(jnp.float32)
                    * w1.astype(jnp.float32), axis=0)          # [2]
    b_eff = jnp.sum(w2[0].astype(jnp.float32)
                    * b1.astype(jnp.float32)) + b2[0]          # scalar
    coefs = jnp.concatenate([w_eff, b_eff[None]]).astype(jnp.float32)  # [3]

    # ---- Tiling: dense (rows, 128) point slabs ----
    r_total = -(-n // 128)                       # rows of 128 points needed
    num_tiles = max(1, -(-r_total // max(1, tile_r_max)))
    if num_tiles == 1 and r_total >= 2 * _MIN_SPLIT_ROWS:
        num_tiles = 2                            # let both v7x TCs work
    tile_r = max(8, _round_up(-(-r_total // num_tiles), 8))   # multiple of 8
    r_pad = tile_r * num_tiles
    n_pad = r_pad * 128

    # Layout glue (single fused XLA pass under jit): feature-major, padded,
    # packed into lane/sublane-dense (rows, 128) slabs.
    x_t = jnp.transpose(x.astype(jnp.float32))               # [2, N]
    x_t = jnp.pad(x_t, ((0, 0), (0, n_pad - n)))              # [2, n_pad]
    x_t = x_t.reshape(2, r_pad, 128)                          # [2, R, 128]

    out = pl.pallas_call(
        _fused_affine_kernel,
        out_shape=jax.ShapeDtypeStruct((r_pad, 128), jnp.float32),
        grid_spec=pltpu.PrefetchScalarGridSpec(
            num_scalar_prefetch=1,               # coefs -> SMEM
            grid=(num_tiles,),
            in_specs=[
                pl.BlockSpec((2, tile_r, 128), lambda i, coefs: (0, i, 0)),
            ],
            out_specs=pl.BlockSpec((tile_r, 128), lambda i, coefs: (i, 0)),
        ),
        compiler_params=pltpu.CompilerParams(
            dimension_semantics=("parallel",),
        ),
    )(coefs, x_t)

    # Dense slab -> [N, 1]; pure (free) reshapes plus one truncation slice.
    return out.reshape(-1)[:n].reshape(n, 1)


def _reference_forward(x, w1, b1, w2, b2):
    # Pure-JAX reference matching PyTorch semantics: y = x @ W.T + b.
    # HIGHEST precision so the reference itself isn't a bf16-pass matmul.
    h = jnp.dot(x, w1.T, precision=jax.lax.Precision.HIGHEST) + b1
    return jnp.dot(h, w2.T, precision=jax.lax.Precision.HIGHEST) + b2


if __name__ == "__main__":
    key = jax.random.PRNGKey(0)
    k_x, k_w1, k_b1, k_w2, k_b2 = jax.random.split(key, 5)

    # Deterministic parameter init mimicking nn.Linear's U(-1/sqrt(fan_in), +)
    def linear_init(kw, kb, out_f, in_f):
        bound = 1.0 / (in_f ** 0.5)
        w = jax.random.uniform(kw, (out_f, in_f), jnp.float32, -bound, bound)
        b = jax.random.uniform(kb, (out_f,), jnp.float32, -bound, bound)
        return w, b

    w1, b1 = linear_init(k_w1, k_b1, 8, 2)   # layer_1: Linear(2 -> 8)
    w2, b2 = linear_init(k_w2, k_b2, 1, 8)   # layer_2: Linear(8 -> 1)

    # Small batch of 2-D points (the "circle" toy-data shape).
    N = 8
    x = jax.random.normal(k_x, (N, 2), dtype=jnp.float32)
    out = jax.block_until_ready(circle_model_naiwna_forward(x, w1, b1, w2, b2))
    ref = _reference_forward(x, w1, b1, w2, b2)
    assert out.shape == (N, 1), out.shape
    assert jnp.allclose(out, ref, atol=1e-5, rtol=1e-5), (out, ref)

    # Second check: ragged N (not a multiple of 128) with a tiny tile so the
    # grid has multiple steps and the padding / parallel-tiling paths run.
    N2 = 1500
    x2 = jax.random.normal(jax.random.PRNGKey(1), (N2, 2), dtype=jnp.float32)
    out2 = jax.block_until_ready(
        circle_model_naiwna_forward(x2, w1, b1, w2, b2, tile_r_max=8))
    ref2 = _reference_forward(x2, w1, b1, w2, b2)
    assert out2.shape == (N2, 1), out2.shape
    assert jnp.allclose(out2, ref2, atol=1e-5, rtol=1e-5)

    print("KERNEL_OK")
</pallas_src>

<mosaic_0001>
module attributes {stable_mosaic.version = 11 : i64} {
  func.func @_fused_affine_kernel(%arg0: i32, %arg1: memref<3xf32, #tpu.memory_space<smem>>, %arg2: memref<2x8x128xf32, #tpu.memory_space<vmem>>, %arg3: memref<8x128xf32, #tpu.memory_space<vmem>>) attributes {dimension_semantics = [#tpu.dimension_semantics<parallel>], iteration_bounds = array<i64: 1>, scalar_prefetch = 1 : i64, scratch_operands = 0 : i64, tpu.core_type = #tpu.core_type<tc>, window_params = [{transform_indices = @transform_0, window_bounds = array<i64: 2, 8, 128>}, {transform_indices = @transform_1, window_bounds = array<i64: 8, 128>}]} {
    %c0 = arith.constant 0 : index
    %0 = memref.load %arg1[%c0] : memref<3xf32, #tpu.memory_space<smem>>
    %c1 = arith.constant 1 : index
    %1 = memref.load %arg1[%c1] : memref<3xf32, #tpu.memory_space<smem>>
    %c2 = arith.constant 2 : index
    %2 = memref.load %arg1[%c2] : memref<3xf32, #tpu.memory_space<smem>>
    %c0_0 = arith.constant 0 : index
    %c0_1 = arith.constant 0 : index
    %c0_2 = arith.constant 0 : index
    %3 = vector.load %arg2[%c0_0, %c0_1, %c0_2] : memref<2x8x128xf32, #tpu.memory_space<vmem>>, vector<1x8x128xf32>
    %4 = vector.shape_cast %3 : vector<1x8x128xf32> to vector<8x128xf32>
    %5 = vector.broadcast %0 : f32 to vector<8x128xf32>
    %6 = arith.mulf %5, %4 : vector<8x128xf32>
    %c1_3 = arith.constant 1 : index
    %c0_4 = arith.constant 0 : index
    %c0_5 = arith.constant 0 : index
    %7 = vector.load %arg2[%c1_3, %c0_4, %c0_5] : memref<2x8x128xf32, #tpu.memory_space<vmem>>, vector<1x8x128xf32>
    %8 = vector.shape_cast %7 : vector<1x8x128xf32> to vector<8x128xf32>
    %9 = vector.broadcast %1 : f32 to vector<8x128xf32>
    %10 = arith.mulf %9, %8 : vector<8x128xf32>
    %11 = arith.addf %6, %10 : vector<8x128xf32>
    %12 = vector.broadcast %2 : f32 to vector<8x128xf32>
    %13 = arith.addf %11, %12 : vector<8x128xf32>
    %c0_6 = arith.constant 0 : index
    %c0_7 = arith.constant 0 : index
    %14 = vector.load %arg3[%c0_6, %c0_7] : memref<8x128xf32, #tpu.memory_space<vmem>>, vector<8x128xf32>
    tpu.vector_store %arg3[%c0_6, %c0_7], %13 {strides = array<i32>} : memref<8x128xf32, #tpu.memory_space<vmem>>, vector<8x128xf32>,
    return
  }
  func.func @transform_0(%arg0: i32, %arg1: memref<3xf32, #tpu.memory_space<smem>>) -> (i32, i32, i32) {
    %c0_i32 = arith.constant 0 : i32
    %c0_i32_0 = arith.constant 0 : i32
    %c0_i32_1 = arith.constant 0 : i32
    return %c0_i32, %arg0, %c0_i32_0 : i32, i32, i32
  }
  func.func @transform_1(%arg0: i32, %arg1: memref<3xf32, #tpu.memory_space<smem>>) -> (i32, i32) {
    %c0_i32 = arith.constant 0 : i32
    %c0_i32_0 = arith.constant 0 : i32
    return %arg0, %c0_i32 : i32, i32
  }
}

</mosaic_0001>

<bundles_post_ra>
// kernel: circle_model_naiwna_forward.1
= control target key start
LH: loop header
LB: loop body
LE: loop exit
PB: predicated region body
PF: predicated region fallthrough
CT: control target
= control target key end

     0   :  { %s53_s12 = smov [#allocation3]   ;;  %s81_s0 = inlined_call_operand.vmem [shape: f32[3], index: 0, kind: input, shape index: {}]   ;;  %s82_s1 = inlined_call_operand.vmem [shape: f32[2,8,128], index: 1, kind: input, shape index: {}]   ;;  %s83_s2 = inlined_call_operand.vmem [shape: f32[8,128], index: 2, kind: output, shape index: {}]  }
   0x1   :  { %s8_s11 = sshll.u32 %s81_s0, 4  ;;  %s9_s11 = int_to_ptr.vmem [resolvable:$true] %s8_s11 }
   0x2   :  { %11 = dma.vmem_to_smem %s9_s11, 16, %s53_s12, [#allocation2] }
   0x3   :  { %51 = dma.done.wait [#allocation2], 16 }
   0x4   :  { %52 = vsyncadd [#allocation2], 4294967280 }
   0x5   :  { %14 = sfence }
   0x6   :  { %s17_s13 = sld [smem:[#allocation3]]  ;;  %v20_v0 = vld [vmem:[%s82_s1] sm:$0xff]  ;;  %v37_v1 = vld [vmem:[%s82_s1 + $0x8] sm:$0xff] }
   0x7   :  { %s35_s14 = sld [smem:[#allocation3 + $0x1]] }
   0x8   :  { %s36_s15 = sld [smem:[#allocation3 + $0x2]] }
   0xc   :  { %v21_v2 = vstv %s17_s13 }
   0xd   :  { %v22_v3 = vmul.f32 %v21_v2, %v20_v0  ;;  %v25_v4 = vstv %s35_s14 }
   0xe   :  { %v26_v5 = vmul.f32 %v37_v1, %v25_v4  ;;  %v28_v6 = vstv %s36_s15 }
  0x10   :  { %v27_v7 = vadd.f32 %v26_v5, %v22_v3 }
  0x12   :  { %v29_v8 = vadd.f32 %v28_v6, %v27_v7 }
  0x14   :  { %30 = vst [vmem:[%s83_s2] sm:$0xff] %v29_v8 }

</bundles_post_ra>
